<compile_context>
chip_gen: v6e
topology: v6e:2x2x1
jax: 0.10.0
libtpu: 0.0.40
codegen_flags: <defaults>
</compile_context>

<pallas_src>
import jax
import jax.numpy as jnp
from jax.experimental import pallas as pl
from jax.experimental.pallas import tpu as pltpu

HIDDEN = 96
_SUBLANE = 16  # multiple of both f32 (8) and bf16-packed (16) sublane tiles


def _round_up(n: int, m: int) -> int:
    return ((n + m - 1) // m) * m


def _cdiv(a: int, b: int) -> int:
    return (a + b - 1) // b


# ----------------------------------------------------------------------------
# Kernel: fused 3-layer MLP on a (tb, d_in) batch tile; weights stay resident.
# ----------------------------------------------------------------------------
def qnet_kernel(x_ref, w1_ref, b1_ref, w2_ref, b2_ref, w3_ref, b3_ref, o_ref):
    # bf16 MXU matmuls with f32 accumulation; bias/ReLU math stays in f32
    # (v5e's VPU has no bf16 path).  x_ref is the *unpadded* (tb, d_in) tile;
    # the contraction dim (37) is padded/masked internally by Mosaic.
    x = x_ref[...].astype(jnp.bfloat16)

    h1 = jnp.dot(x, w1_ref[...], preferred_element_type=jnp.float32) + b1_ref[...]
    h1 = jnp.maximum(h1, 0.0).astype(jnp.bfloat16)

    h2 = jnp.dot(h1, w2_ref[...], preferred_element_type=jnp.float32) + b2_ref[...]
    h2 = jnp.maximum(h2, 0.0).astype(jnp.bfloat16)

    out = jnp.dot(h2, w3_ref[...], preferred_element_type=jnp.float32) + b3_ref[...]
    # Lane-dense (tb, 128) slab, bf16 -> unmasked stores, half the writeback bytes.
    o_ref[...] = out.astype(o_ref.dtype)


# ----------------------------------------------------------------------------
# Batch tiling: big tiles, minimal dead rows, >=2 balanced steps on big batches.
# ----------------------------------------------------------------------------
def _batch_tiling(batch: int, max_tile: int):
    batch_p = _round_up(max(batch, _SUBLANE), _SUBLANE)
    max_tile = max(_round_up(max_tile, _SUBLANE), _SUBLANE)
    # >=2 balanced grid steps once the batch is large enough that per-step
    # overhead is negligible -> both v7x TensorCores get work.  Small batches
    # keep a single biggest tile (overhead-bound regime).
    min_steps = 2 if batch_p >= 1024 else 1
    steps = max(min_steps, _cdiv(batch_p, max_tile))
    tb = _round_up(_cdiv(batch_p, steps), _SUBLANE)
    steps = _cdiv(batch_p, tb)
    return steps * tb, tb, steps


# ----------------------------------------------------------------------------
# Wrapper
# ----------------------------------------------------------------------------
def qnet_forward(x, padded_params, action_no, *, max_batch_tile=2048):
    """x: (batch, input_dim) f32 (unpadded). padded_params: lane-padded weights."""
    w1, b1, w2, b2, w3, b3 = padded_params
    batch, d_in = x.shape
    assert w1.shape[0] == d_in, "w1 must be stored (input_dim, hidden_padded)"
    a_p = w3.shape[1]

    batch_pad, tb, steps = _batch_tiling(batch, max_batch_tile)
    if batch_pad != batch:
        # Only a handful of zero rows (<= 2*_SUBLANE-1); no feature-dim padding.
        x = jnp.pad(x, ((0, batch_pad - batch), (0, 0)))

    # Rough per-call VMEM need: double-buffered x/out tiles, resident weights,
    # and f32 activation temporaries (generous headroom).
    est_vmem = (2 * tb * d_in * 4          # x tiles (f32, double-buffered)
                + 2 * tb * a_p * 2         # out tiles (bf16, double-buffered)
                + 8 * tb * 128 * 4         # activation temporaries
                + (1 << 19))               # weights / biases / slack
    cp_kwargs = dict(dimension_semantics=("parallel",))
    if est_vmem > 12 * 1024 * 1024:        # only needed past v5e's 16 MiB default
        cp_kwargs["vmem_limit_bytes"] = min(est_vmem, 60 * 1024 * 1024)

    weight_spec = lambda a: pl.BlockSpec(a.shape, lambda i: (0, 0))  # resident

    out = pl.pallas_call(
        qnet_kernel,
        out_shape=jax.ShapeDtypeStruct((batch_pad, a_p), jnp.bfloat16),
        grid=(steps,),
        in_specs=[
            pl.BlockSpec((tb, d_in), lambda i: (i, 0)),   # unpadded features
            weight_spec(w1), weight_spec(b1),
            weight_spec(w2), weight_spec(b2),
            weight_spec(w3), weight_spec(b3),
        ],
        out_specs=pl.BlockSpec((tb, a_p), lambda i: (i, 0)),
        compiler_params=pltpu.CompilerParams(**cp_kwargs),
    )(x, w1, b1, w2, b2, w3, b3)

    # Slice away padded batch rows and padded action lanes (padded weight
    # columns and biases are zero, so no leakage into the real outputs).
    return out[:batch, :action_no].astype(jnp.float32)


# ----------------------------------------------------------------------------
# Parameter init (torch.nn.Linear default: U(-1/sqrt(fan_in), +)) and padding
# ----------------------------------------------------------------------------
def init_params(key, input_dim, action_no, hidden=HIDDEN):
    ks = jax.random.split(key, 6)

    def linear(kw, kb, fan_in, fan_out):
        bound = 1.0 / jnp.sqrt(jnp.float32(fan_in))
        w = jax.random.uniform(kw, (fan_in, fan_out), jnp.float32, -bound, bound)
        b = jax.random.uniform(kb, (1, fan_out), jnp.float32, -bound, bound)
        return w, b

    w1, b1 = linear(ks[0], ks[1], input_dim, hidden)
    w2, b2 = linear(ks[2], ks[3], hidden, hidden)
    w3, b3 = linear(ks[4], ks[5], hidden, action_no)
    return (w1, b1, w2, b2, w3, b3)


def pad_params(params, h_p, a_p):
    """Zero-pad hidden/action dims to lane-dense 128; weights -> bf16, biases f32.

    w1 keeps its *unpadded* input dim (rows) so the kernel can read x without
    feature padding.  Zero-padded columns + zero-padded biases guarantee the
    padded hidden lanes stay exactly 0 through ReLU (no leakage).
    """
    w1, b1, w2, b2, w3, b3 = params
    d_in = w1.shape[0]

    def pad_w(w, rows, cols):
        out = jnp.zeros((rows, cols), jnp.bfloat16)
        return out.at[: w.shape[0], : w.shape[1]].set(w.astype(jnp.bfloat16))

    def pad_b(b, cols):
        out = jnp.zeros((1, cols), jnp.float32)
        return out.at[:, : b.shape[1]].set(b)

    return (
        pad_w(w1, d_in, h_p), pad_b(b1, h_p),
        pad_w(w2, h_p, h_p),  pad_b(b2, h_p),
        pad_w(w3, h_p, a_p),  pad_b(b3, a_p),
    )


# ----------------------------------------------------------------------------
# References
# ----------------------------------------------------------------------------
def qnet_reference_f32(x, params):
    """Pure f32 reference with the original (unpadded) parameters."""
    w1, b1, w2, b2, w3, b3 = params
    h1 = jnp.maximum(x @ w1 + b1, 0.0)
    h2 = jnp.maximum(h1 @ w2 + b2, 0.0)
    return h2 @ w3 + b3


def qnet_reference_kernel_numerics(x, padded_params, action_no):
    """Reference mirroring the kernel's bf16-matmul / f32-accumulate / bf16-store numerics."""
    w1, b1, w2, b2, w3, b3 = padded_params
    h1 = jnp.maximum(
        jnp.dot(x.astype(jnp.bfloat16), w1, preferred_element_type=jnp.float32) + b1, 0.0)
    h2 = jnp.maximum(
        jnp.dot(h1.astype(jnp.bfloat16), w2, preferred_element_type=jnp.float32) + b2, 0.0)
    q = jnp.dot(h2.astype(jnp.bfloat16), w3, preferred_element_type=jnp.float32) + b3
    return q.astype(jnp.bfloat16)[:, :action_no].astype(jnp.float32)


if __name__ == "__main__":
    key = jax.random.PRNGKey(0)
    k_x, k_p, k_x2 = jax.random.split(key, 3)

    # Banana-eater env: 37-dim state, 4 actions; small act()-style batch.
    batch, input_dim, action_no = 8, 37, 4

    x = jax.random.normal(k_x, (batch, input_dim), jnp.float32)
    params = init_params(k_p, input_dim, action_no)

    # Lane-dense padded parameters (hidden 96->128, actions 4->128; input stays 37).
    h_p = _round_up(HIDDEN, 128)
    a_p = _round_up(action_no, 128)
    padded_params = pad_params(params, h_p, a_p)

    out = qnet_forward(x, padded_params, action_no)
    out = jax.block_until_ready(out)
    assert out.shape == (batch, action_no)

    # Tight check against a reference with identical bf16/f32 numerics.
    ref_exact = qnet_reference_kernel_numerics(x, padded_params, action_no)
    assert jnp.allclose(out, ref_exact, atol=2e-3, rtol=2e-3)

    # Sanity check against the pure-f32 PyTorch-style forward (bf16 tolerance).
    ref_f32 = qnet_reference_f32(x, params)
    assert jnp.allclose(out, ref_f32, atol=5e-2, rtol=5e-2)

    # Training-size, non-multiple batch: exercises row padding, adaptive tiles,
    # and the >=2-step balanced grid (v7x megacore path).
    batch2 = 1037
    x2 = jax.random.normal(k_x2, (batch2, input_dim), jnp.float32)
    out2 = jax.block_until_ready(qnet_forward(x2, padded_params, action_no))
    assert out2.shape == (batch2, action_no)
    ref2 = qnet_reference_f32(x2, params)
    assert jnp.allclose(out2, ref2, atol=5e-2, rtol=5e-2)

    print("KERNEL_OK")
</pallas_src>

<mosaic_0001>
module attributes {stable_mosaic.version = 11 : i64} {
  func.func @qnet_kernel(%arg0: i32, %arg1: memref<16x37xf32, #tpu.memory_space<vmem>>, %arg2: memref<37x128xbf16, #tpu.memory_space<vmem>>, %arg3: memref<1x128xf32, #tpu.memory_space<vmem>>, %arg4: memref<128x128xbf16, #tpu.memory_space<vmem>>, %arg5: memref<1x128xf32, #tpu.memory_space<vmem>>, %arg6: memref<128x128xbf16, #tpu.memory_space<vmem>>, %arg7: memref<1x128xf32, #tpu.memory_space<vmem>>, %arg8: memref<16x128xbf16, #tpu.memory_space<vmem>>) attributes {dimension_semantics = [#tpu.dimension_semantics<parallel>], iteration_bounds = array<i64: 1>, scalar_prefetch = 0 : i64, scratch_operands = 0 : i64, tpu.core_type = #tpu.core_type<tc>, window_params = [{transform_indices = @transform_0, window_bounds = array<i64: 16, 37>}, {pipeline_mode = #tpu.pipeline_mode<synchronous>, transform_indices = @transform_1, window_bounds = array<i64: 37, 128>}, {pipeline_mode = #tpu.pipeline_mode<synchronous>, transform_indices = @transform_2, window_bounds = array<i64: 1, 128>}, {pipeline_mode = #tpu.pipeline_mode<synchronous>, transform_indices = @transform_3, window_bounds = array<i64: 128, 128>}, {pipeline_mode = #tpu.pipeline_mode<synchronous>, transform_indices = @transform_4, window_bounds = array<i64: 1, 128>}, {pipeline_mode = #tpu.pipeline_mode<synchronous>, transform_indices = @transform_5, window_bounds = array<i64: 128, 128>}, {pipeline_mode = #tpu.pipeline_mode<synchronous>, transform_indices = @transform_6, window_bounds = array<i64: 1, 128>}, {transform_indices = @transform_7, window_bounds = array<i64: 16, 128>}]} {
    %c0 = arith.constant 0 : index
    %c0_0 = arith.constant 0 : index
    %0 = vector.load %arg1[%c0, %c0_0] : memref<16x37xf32, #tpu.memory_space<vmem>>, vector<16x37xf32>
    %1 = arith.truncf %0 : vector<16x37xf32> to vector<16x37xbf16>
    %c0_1 = arith.constant 0 : index
    %c0_2 = arith.constant 0 : index
    %2 = vector.load %arg2[%c0_1, %c0_2] : memref<37x128xbf16, #tpu.memory_space<vmem>>, vector<37x128xbf16>
    %cst = arith.constant dense<0.000000e+00> : vector<16x128xf32>
    %3 = tpu.matmul %1, %2, %cst {dimension_numbers = #tpu.dot_dimension_numbers<[1], [0], [0], [1], [0, 0, 1, 1], [], []>} : vector<16x37xbf16>, vector<37x128xbf16>, vector<16x128xf32> -> vector<16x128xf32>
    %c0_3 = arith.constant 0 : index
    %c0_4 = arith.constant 0 : index
    %4 = vector.load %arg3[%c0_3, %c0_4] : memref<1x128xf32, #tpu.memory_space<vmem>>, vector<1x128xf32>
    %5 = vector.broadcast %4 : vector<1x128xf32> to vector<16x128xf32>
    %6 = arith.addf %3, %5 : vector<16x128xf32>
    %cst_5 = arith.constant 0.000000e+00 : f32
    %7 = vector.broadcast %cst_5 : f32 to vector<16x128xf32>
    %8 = arith.maximumf %6, %7 : vector<16x128xf32>
    %9 = arith.truncf %8 : vector<16x128xf32> to vector<16x128xbf16>
    %c0_6 = arith.constant 0 : index
    %c0_7 = arith.constant 0 : index
    %10 = vector.load %arg4[%c0_6, %c0_7] : memref<128x128xbf16, #tpu.memory_space<vmem>>, vector<128x128xbf16>
    %cst_8 = arith.constant dense<0.000000e+00> : vector<16x128xf32>
    %11 = tpu.matmul %9, %10, %cst_8 {dimension_numbers = #tpu.dot_dimension_numbers<[1], [0], [0], [1], [0, 0, 1, 1], [], []>} : vector<16x128xbf16>, vector<128x128xbf16>, vector<16x128xf32> -> vector<16x128xf32>
    %c0_9 = arith.constant 0 : index
    %c0_10 = arith.constant 0 : index
    %12 = vector.load %arg5[%c0_9, %c0_10] : memref<1x128xf32, #tpu.memory_space<vmem>>, vector<1x128xf32>
    %13 = vector.broadcast %12 : vector<1x128xf32> to vector<16x128xf32>
    %14 = arith.addf %11, %13 : vector<16x128xf32>
    %cst_11 = arith.constant 0.000000e+00 : f32
    %15 = vector.broadcast %cst_11 : f32 to vector<16x128xf32>
    %16 = arith.maximumf %14, %15 : vector<16x128xf32>
    %17 = arith.truncf %16 : vector<16x128xf32> to vector<16x128xbf16>
    %c0_12 = arith.constant 0 : index
    %c0_13 = arith.constant 0 : index
    %18 = vector.load %arg6[%c0_12, %c0_13] : memref<128x128xbf16, #tpu.memory_space<vmem>>, vector<128x128xbf16>
    %cst_14 = arith.constant dense<0.000000e+00> : vector<16x128xf32>
    %19 = tpu.matmul %17, %18, %cst_14 {dimension_numbers = #tpu.dot_dimension_numbers<[1], [0], [0], [1], [0, 0, 1, 1], [], []>} : vector<16x128xbf16>, vector<128x128xbf16>, vector<16x128xf32> -> vector<16x128xf32>
    %c0_15 = arith.constant 0 : index
    %c0_16 = arith.constant 0 : index
    %20 = vector.load %arg7[%c0_15, %c0_16] : memref<1x128xf32, #tpu.memory_space<vmem>>, vector<1x128xf32>
    %21 = vector.broadcast %20 : vector<1x128xf32> to vector<16x128xf32>
    %22 = arith.addf %19, %21 : vector<16x128xf32>
    %23 = arith.truncf %22 : vector<16x128xf32> to vector<16x128xbf16>
    %c0_17 = arith.constant 0 : index
    %c0_18 = arith.constant 0 : index
    %24 = vector.load %arg8[%c0_17, %c0_18] : memref<16x128xbf16, #tpu.memory_space<vmem>>, vector<16x128xbf16>
    tpu.vector_store %arg8[%c0_17, %c0_18], %23 {strides = array<i32>} : memref<16x128xbf16, #tpu.memory_space<vmem>>, vector<16x128xbf16>,
    return
  }
  func.func @transform_0(%arg0: i32) -> (i32, i32) {
    %c0_i32 = arith.constant 0 : i32
    %c0_i32_0 = arith.constant 0 : i32
    return %arg0, %c0_i32 : i32, i32
  }
  func.func @transform_1(%arg0: i32) -> (i32, i32) {
    %c0_i32 = arith.constant 0 : i32
    %c0_i32_0 = arith.constant 0 : i32
    %c0_i32_1 = arith.constant 0 : i32
    return %c0_i32, %c0_i32_0 : i32, i32
  }
  func.func @transform_2(%arg0: i32) -> (i32, i32) {
    %c0_i32 = arith.constant 0 : i32
    %c0_i32_0 = arith.constant 0 : i32
    %c0_i32_1 = arith.constant 0 : i32
    return %c0_i32, %c0_i32_0 : i32, i32
  }
  func.func @transform_3(%arg0: i32) -> (i32, i32) {
    %c0_i32 = arith.constant 0 : i32
    %c0_i32_0 = arith.constant 0 : i32
    %c0_i32_1 = arith.constant 0 : i32
    return %c0_i32, %c0_i32_0 : i32, i32
  }
  func.func @transform_4(%arg0: i32) -> (i32, i32) {
    %c0_i32 = arith.constant 0 : i32
    %c0_i32_0 = arith.constant 0 : i32
    %c0_i32_1 = arith.constant 0 : i32
    return %c0_i32, %c0_i32_0 : i32, i32
  }
  func.func @transform_5(%arg0: i32) -> (i32, i32) {
    %c0_i32 = arith.constant 0 : i32
    %c0_i32_0 = arith.constant 0 : i32
    %c0_i32_1 = arith.constant 0 : i32
    return %c0_i32, %c0_i32_0 : i32, i32
  }
  func.func @transform_6(%arg0: i32) -> (i32, i32) {
    %c0_i32 = arith.constant 0 : i32
    %c0_i32_0 = arith.constant 0 : i32
    %c0_i32_1 = arith.constant 0 : i32
    return %c0_i32, %c0_i32_0 : i32, i32
  }
  func.func @transform_7(%arg0: i32) -> (i32, i32) {
    %c0_i32 = arith.constant 0 : i32
    %c0_i32_0 = arith.constant 0 : i32
    return %arg0, %c0_i32 : i32, i32
  }
}

</mosaic_0001>

<bundles_post_ra>
// kernel: tpu_custom_call.1
= control target key start
LH: loop header
LB: loop body
LE: loop exit
PB: predicated region body
PF: predicated region fallthrough
CT: control target
= control target key end

     0   :  { %12 = vsyncpa [#allocation3], 0  ;;  %s780_s0 = inlined_call_operand.hbm [shape: f32[16,37], index: 0, kind: input, shape index: {}]   ;;  %s781_s1 = inlined_call_operand.hbm [shape: bf16[37,128], index: 1, kind: input, shape index: {}]   ;;  %s782_s2 = inlined_call_operand.vmem [shape: f32[1,128], index: 2, kind: input, shape index: {}]   ;;  %s783_s3 = inlined_call_operand.hbm [shape: bf16[128,128], index: 3, kind: input, shape index: {}]   ;;  %s784_s4 = inlined_call_operand.vmem [shape: f32[1,128], index: 4, kind: input, shape index: {}]   ;;  %s785_s5 = inlined_call_operand.hbm [shape: bf16[128,128], index: 5, kind: input, shape index: {}]   ;;  %s786_s6 = inlined_call_operand.vmem [shape: f32[1,128], index: 6, kind: input, shape index: {}]   ;;  %s787_s7 = inlined_call_operand.hbm [shape: bf16[16,128], index: 7, kind: output, shape index: {}]  }
   0x1   :  { %13 = vsyncpa [#allocation6], 0 }
   0x2   :  { %14 = vsyncpa [#allocation9], 0 }
   0x3   :  { %15 = vsyncpa [#allocation4], 0  ;;  %s667_s24 = smov [#allocation5]  }
   0x4   :  { %s33_s25 = sshll.u32 %s667_s24, 4  ;;  %s34_s25 = int_to_ptr.vmem [resolvable:$true] %s33_s25 }
   0x5   :  { %s567_s26 = scalar_lea.vmem %s34_s25, 320  ;;  %p572_p1 = scmp.lt.s32.totalorder %s34_s25, %s34_s25 }
   0x6   :  { %p568_p0 = scmp.ne.s32.totalorder %s34_s25, %s567_s26  ;;  %p573_p2 = scmp.lt.s32.totalorder %s567_s26, %s567_s26 }
   0x8   :  { %p574_p3 = por %p573_p2, %p572_p1 }
   0xa   :  { %p575_p4 = pnand %p574_p3, %p568_p0 }
   0xc   :  { %578 = shalt.err (!%p575_p4)
}
   0xd   :  { %s668_s27 = smov 64   ;;  %s669_s28 = smov 4  }
   0xe   :  { %39 = dma.hbm_to_vmem [thread:$0]  %s781_s1, 320, %s34_s25, [#allocation6], %s668_s27, %s668_s27, %s669_s28  }
   0xf   :  { %s670_s8 = smov [#allocation2]  }
  0x10   :  { %s21_s9 = sshll.u32 %s670_s8, 4  ;;  %s22_s9 = int_to_ptr.vmem [resolvable:$true] %s21_s9 }
  0x11   :  { %s587_s10 = scalar_lea.vmem %s22_s9, 256  ;;  %p592_p6 = scmp.lt.s32.totalorder %s22_s9, %s22_s9 }
  0x12   :  { %p588_p5 = scmp.ne.s32.totalorder %s22_s9, %s587_s10  ;;  %p593_p7 = scmp.lt.s32.totalorder %s587_s10, %s587_s10 }
  0x14   :  { %p594_p8 = por %p593_p7, %p592_p6 }
  0x16   :  { %p595_p9 = pnand %p594_p8, %p588_p5 }
  0x18   :  { %598 = shalt.err (!%p595_p9)
}
  0x19   :  { %s671_s11 = smov 128   ;;  %s672_s12 = smov 8  }
  0x1a   :  { %27 = dma.hbm_to_vmem [thread:$0]  %s780_s0, 256, %s22_s9, [#allocation3], %s671_s11, %s671_s11, %s672_s12  }
  0x1b   :  { %s673_s15 = smov [#allocation7]   ;;  %s674_s17 = smov [#allocation8]  }
  0x1c   :  { %s47_s16 = sshll.u32 %s673_s15, 4  ;;  %s61_s1 = sshll.u32 %s674_s17, 4  ;;  %s48_s16 = int_to_ptr.vmem [resolvable:$true] %s47_s16  ;;  %s62_s1 = int_to_ptr.vmem [resolvable:$true] %s61_s1 }
  0x1d   :  { %s607_s18 = scalar_lea.vmem %s48_s16, 1024  ;;  %p612_p11 = scmp.lt.s32.totalorder %s48_s16, %s48_s16 }
  0x1e   :  { %p608_p10 = scmp.ne.s32.totalorder %s48_s16, %s607_s18  ;;  %p613_p12 = scmp.lt.s32.totalorder %s607_s18, %s607_s18 }
  0x20   :  { %p614_p13 = por %p613_p12, %p612_p11 }
  0x22   :  { %p615_p0 = pnand %p614_p13, %p608_p10 }
  0x24   :  { %618 = shalt.err (!%p615_p0)
}
  0x25   :  { %53 = dma.hbm_to_vmem [thread:$0]  %s783_s3, 1024, %s48_s16, [#allocation6], %s668_s27, %s668_s27, %s669_s28  }
  0x26   :  { %s627_s0 = scalar_lea.vmem %s62_s1, 1024  ;;  %p632_p2 = scmp.lt.s32.totalorder %s62_s1, %s62_s1 }
  0x27   :  { %p628_p1 = scmp.ne.s32.totalorder %s62_s1, %s627_s0  ;;  %p633_p3 = scmp.lt.s32.totalorder %s627_s0, %s627_s0 }
  0x29   :  { %p634_p4 = por %p633_p3, %p632_p2 }
  0x2b   :  { %p635_p5 = pnand %p634_p4, %p628_p1 }
  0x2d   :  { %638 = shalt.err (!%p635_p5)
}
  0x2e   :  { %67 = dma.hbm_to_vmem [thread:$0]  %s785_s5, 1024, %s62_s1, [#allocation9], %s668_s27, %s668_s27, %s669_s28  }
  0x2f   :  { %659 = dma.done.wait [#allocation3], 256  }
  0x30   :  { %660 = vsyncadd [#allocation3], 4294967040 }
  0x31   :  { %661 = dma.done.wait [#allocation6], 1344  }
  0x32   :  { %662 = vsyncadd [#allocation6], 4294965952 }
  0x33   :  { %663 = dma.done.wait [#allocation9], 1024  }
  0x34   :  { %664 = vsyncadd [#allocation9], 4294966272  ;;  %vm117_vm0 = vcmask 1041408   ;;  %v675_v0 = vmov 0.0   ;;  %vm676_vm1 = vmmov 0   ;;  %vm118_vm2 = vcmask 1042432  }
  0x35   :  { %478 = vmatprep.subr.bf16.mxu0 %v675_v0  ;;  %488 = vmatprep.subr.bf16.mxu1 %v675_v0  ;;  %v677_v1 = vmov 65535   ;;  %v540_v4 = vld [vmem:[#allocation5 + $0x10] ss:$0 sps:$4 sm:$0x77]   ;;  %v541_v6 = vld [vmem:[#allocation5 + $0x8] sm:$0xff]   ;;  %v542_v8 = vld [vmem:[#allocation5] sm:$0xff]  }
  0x36   :  { %484 = vmatprep.mubr.msk.bf16.mxu0 %vm676_vm1, %v675_v0  ;;  %504 = vmatprep.mubr.msk.bf16.mxu1 %vm676_vm1, %v675_v0  ;;  %v119_v2 = vsel %vm117_vm0, 4294967295, %v677_v1  ;;  %v543_v7 = vld [vmem:[#allocation7 + $0x38] sm:$0xff]   ;;  %v544_v9 = vld [vmem:[#allocation7 + $0x30] sm:$0xff]   ;;  %v84_v11 = vld [vmem:[#allocation2 + $0x8] sm:$0xff]  ;;  %vm113_vm3 = vcmask 302080   ;;  %s678_s26 = smov [#allocation10]  }
  0x37   :  { %v120_v3 = vsel %vm118_vm2, %v119_v2, 0  ;;  %489 = vmatpush3.bf16.msra.mxu1 %v543_v7  ;;  %v83_v10 = vld [vmem:[#allocation2] sm:$0xff]  ;;  %v545_v12 = vld [vmem:[#allocation7 + $0x28] sm:$0xff]   ;;  %v548_v16 = vld [vmem:[#allocation7 + $0x10] sm:$0xff]   ;;  %s410_s29 = sshll.u32 %s678_s26, 4  ;;  %s411_s29 = int_to_ptr.vmem [resolvable:$true] %s410_s29 }
  0x38   :  { %v122_v5 = vand.u32 %v540_v4, %v120_v3  ;;  %490 = vmatprep.subr.bf16.mxu1 %v675_v0  ;;  %v85_v13 = vpack.c.bf16 %v84_v11, %v83_v10  ;;  %v546_v14 = vld [vmem:[#allocation7 + $0x20] sm:$0xff]   ;;  %v547_v15 = vld [vmem:[#allocation7 + $0x18] sm:$0xff]   ;;  %v549_v17 = vld [vmem:[#allocation7 + $0x8] sm:$0xff]   ;;  %p644_p7 = scmp.lt.s32.totalorder %s411_s29, %s411_s29 }
  0x39   :  { %v550_v18 = vld [vmem:[#allocation7] sm:$0xff]   ;;  %v551_v19 = vld [vmem:[#allocation8 + $0x38] sm:$0xff]   ;;  %v552_v20 = vld [vmem:[#allocation8 + $0x30] sm:$0xff]  }
  0x3a   :  { %479 = vmatpush3.bf16.msra.mxu0 %v122_v5  ;;  %v553_v21 = vld [vmem:[#allocation8 + $0x28] sm:$0xff]   ;;  %v554_v22 = vld [vmem:[#allocation8 + $0x20] sm:$0xff]   ;;  %v555_v23 = vld [vmem:[#allocation8 + $0x18] sm:$0xff]  }
  0x3b   :  { %480 = vmatprep.subr.bf16.mxu0 %v675_v0  ;;  %491 = vmatpush3.bf16.msra.mxu1 %v544_v9  ;;  %v424_v24 = vld [vmem:[%s782_s2] ss:$0 sm:$0xff]  ;;  %v556_v34 = vld [vmem:[#allocation8 + $0x10] sm:$0xff]   ;;  %v557_v35 = vld [vmem:[#allocation8 + $0x8] sm:$0xff]  }
  0x3c   :  { %492 = vmatprep.subr.bf16.mxu1 %v675_v0  ;;  %v558_v36 = vld [vmem:[#allocation8] sm:$0xff]   ;;  %v429_v37 = vld [vmem:[%s784_s4] ss:$0 sm:$0xff]  ;;  %s639_s4 = scalar_lea.vmem %s411_s29, 128 }
  0x3d   :  { %v438_v48 = vld [vmem:[%s786_s6] ss:$0 sm:$0xff]  ;;  %p640_p6 = scmp.ne.s32.totalorder %s411_s29, %s639_s4  ;;  %p645_p8 = scmp.lt.s32.totalorder %s639_s4, %s639_s4 }
  0x3e   :  { %481 = vmatpush3.bf16.msra.mxu0 %v541_v6 }
  0x3f   :  { %482 = vmatprep.subr.bf16.mxu0 %v675_v0  ;;  %493 = vmatpush3.bf16.msra.mxu1 %v545_v12  ;;  %p646_p9 = por %p645_p8, %p644_p7 }
  0x40   :  { %494 = vmatprep.subr.bf16.mxu1 %v675_v0 }
  0x41   :  { %p647_p10 = pnand %p646_p9, %p640_p6 }
  0x42   :  { %483 = vmatpush3.bf16.msra.mxu0 %v542_v8 }
  0x43   :  { %508 = vmatprep.subr.bf16.mxu0 %v675_v0  ;;  %495 = vmatpush3.bf16.msra.mxu1 %v546_v14 }
  0x44   :  { %496 = vmatprep.subr.bf16.mxu1 %v675_v0 }
  0x45   :  { %485 = vmatmul.mubr.msk.bf16.vlgmr.msra.gmra.mxu0 %vm113_vm3, %v85_v13 }
  0x46   :  { %524 = vmatprep.mubr.msk.bf16.mxu0 %vm676_vm1, %v675_v0  ;;  %509 = vmatpush3.bf16.msra.mxu0 %v551_v19 }
  0x47   :  { %497 = vmatpush3.bf16.msra.mxu1 %v547_v15  ;;  %510 = vmatprep.subr.bf16.mxu0 %v675_v0 }
  0x48   :  { %498 = vmatprep.subr.bf16.mxu1 %v675_v0 }
  0x4a   :  { %511 = vmatpush3.bf16.msra.mxu0 %v552_v20 }
  0x4b   :  { %499 = vmatpush3.bf16.msra.mxu1 %v548_v16  ;;  %512 = vmatprep.subr.bf16.mxu0 %v675_v0 }
  0x4c   :  { %500 = vmatprep.subr.bf16.mxu1 %v675_v0 }
  0x4e   :  { %513 = vmatpush3.bf16.msra.mxu0 %v553_v21 }
  0x4f   :  { %501 = vmatpush3.bf16.msra.mxu1 %v549_v17  ;;  %514 = vmatprep.subr.bf16.mxu0 %v675_v0 }
  0x50   :  { %502 = vmatprep.subr.bf16.mxu1 %v675_v0 }
  0x52   :  { %515 = vmatpush3.bf16.msra.mxu0 %v554_v22 }
  0x53   :  { %503 = vmatpush3.bf16.msra.mxu1 %v550_v18  ;;  %516 = vmatprep.subr.bf16.mxu0 %v675_v0 }
  0x56   :  { %517 = vmatpush3.bf16.msra.mxu0 %v555_v23 }
  0x57   :  { %518 = vmatprep.subr.bf16.mxu0 %v675_v0 }
  0x5a   :  { %519 = vmatpush3.bf16.msra.mxu0 %v556_v34 }
  0x5b   :  { %520 = vmatprep.subr.bf16.mxu0 %v675_v0 }
  0x5e   :  { %521 = vmatpush3.bf16.msra.mxu0 %v557_v35 }
  0x5f   :  { %522 = vmatprep.subr.bf16.mxu0 %v675_v0 }
  0x62   :  { %523 = vmatpush3.bf16.msra.mxu0 %v558_v36 }
 0x105   :  { %v158_v25 = vpop.f32.mrf.mxu0 }
 0x106   :  { %v159_v27 = vadd.f32 %v424_v24, %v158_v25 }
 0x107   :  { %v486_v26 = vpop.f32.mrf.mxu0 }
 0x108   :  { %v165_v31 = vmax.f32 %v159_v27, 0.0 }
 0x109   :  { %v161_v28 = vpop.f32.mrf.mxu0 }
 0x10a   :  { %v162_v29 = vadd.f32 %v424_v24, %v161_v28 }
 0x10b   :  { %v487_v30 = vpop.f32.mrf.mxu0 }
 0x10c   :  { %v166_v32 = vmax.f32 %v162_v29, 0.0 }
 0x10e   :  { %v167_v33 = vpack.c.bf16 %v166_v32, %v165_v31 }
 0x110   :  { %505 = vmatmul.mubr.bf16.vlgmr.msra.gmra.mxu1 %v167_v33 }
 0x1d0   :  { %v273_v38 = vpop.f32.mrf.mxu1 }
 0x1d1   :  { %v274_v40 = vadd.f32 %v429_v37, %v273_v38 }
 0x1d2   :  { %v506_v39 = vpop.f32.mrf.mxu1 }
 0x1d3   :  { %v280_v44 = vmax.f32 %v274_v40, 0.0 }
 0x1d4   :  { %v276_v41 = vpop.f32.mrf.mxu1 }
 0x1d5   :  { %v277_v42 = vadd.f32 %v429_v37, %v276_v41 }
 0x1d6   :  { %v507_v43 = vpop.f32.mrf.mxu1 }
 0x1d7   :  { %v281_v45 = vmax.f32 %v277_v42, 0.0 }
 0x1d9   :  { %v282_v46 = vpack.c.bf16 %v281_v45, %v280_v44 }
 0x1db   :  { %525 = vmatmul.mubr.bf16.vlgmr.msra.gmra.mxu0 %v282_v46 }
 0x29b   :  { %v388_v47 = vpop.f32.mrf.mxu0 }
 0x29c   :  { %v389_v51 = vadd.f32 %v438_v48, %v388_v47 }
 0x29d   :  { %v526_v49 = vpop.f32.mrf.mxu0 }
 0x29f   :  { %v391_v50 = vpop.f32.mrf.mxu0 }
 0x2a0   :  { %v392_v52 = vadd.f32 %v438_v48, %v391_v50 }
 0x2a1   :  { %v527_v53 = vpop.f32.mrf.mxu0 }
 0x2a2   :  { %v454_v54 = vpack.c.bf16 %v392_v52, %v389_v51 }
 0x2a4   :  { %455 = vst [vmem:[#allocation10] sm:$0xff] %v454_v54  }
 0x2a5   :  { %650 = shalt.err (!%p647_p10)
}
 0x2a6   :  { %416 = dma.vmem_to_hbm [thread:$0]  %s411_s29, 128, %s787_s7, [#allocation4], %s668_s27, %s668_s27, %s669_s28  }
 0x2a7   :  { %665 = dma.done.wait [#allocation4], 128  }
 0x2a8   :  { %666 = vsyncadd [#allocation4], 4294967168 }
 0x2a9   :  { %420 = vsyncpa [#allocation3], 1 }
 0x2aa   :  { %421 = vsyncpa [#allocation6], 1 }
 0x2ab   :  { %422 = vsyncpa [#allocation9], 1 }
 0x2ac   :  { %423 = vsyncpa [#allocation4], 1 }

</bundles_post_ra>
